<compile_context>
chip_gen: v5e
topology: v5e:2x2
jax: 0.10.0
libtpu: 0.0.40
codegen_flags: <defaults>
</compile_context>

<pallas_src>
import jax
import jax.numpy as jnp
from jax.experimental import pallas as pl
from jax.experimental.pallas import tpu as pltpu


def _att_kernel(x_ref, mask_ref, wv_ref, bv_ref, out_ref, h_ref):
    bt, n, din = x_ref.shape
    hdim = wv_ref.shape[1]

    # v = relu(x @ Wv + bv), computed for all Bt*N rows in one MXU matmul.
    x2d = x_ref[...].reshape(bt * n, din)
    v = jnp.dot(x2d, wv_ref[...], preferred_element_type=jnp.float32) + bv_ref[...]
    v = jnp.maximum(v, 0.0).reshape(bt, n, hdim)

    # h = mask (the q@k value is discarded by `mask.view_as(...)` in PyTorch),
    # with zeros replaced by -900000.0 (scalar fill -> no broadcast constant).
    m = mask_ref[...]
    h = jnp.where(m != 0, m, -900000.0)

    # softmax over the last axis
    h_max = jnp.max(h, axis=-1, keepdims=True)
    e = jnp.exp(h - h_max)
    denom = jnp.sum(e, axis=-1, keepdims=True)
    r = pl.reciprocal(denom, approx=True)   # EUP slot (cheap)
    r = r * (2.0 - denom * r)               # one Newton step -> ~f32 accuracy
    att = e * r

    # out = att @ v  (batched over the Bt batches in this block)
    out = jnp.einsum("bij,bjh->bih", att, v, preferred_element_type=jnp.float32)

    out_ref[...] = out.astype(out_ref.dtype)
    h_ref[...] = h.astype(h_ref.dtype)


def _choose_batch_tile(B, N, din, H, budget_bytes=32 * 1024 * 1024):
    """Largest divisor of B whose (double-buffered) f32 blocks fit the budget."""
    per_batch = 4 * (N * din + 2 * N * N + 2 * N * H)  # x, mask, h, out, v
    per_batch *= 2                                      # double buffering
    bt = max(1, min(B, budget_bytes // max(per_batch, 1)))
    while B % bt:
        bt -= 1
    return bt


def att_model_forward(x, mask, params):
    """x: (B, N, din) f32, mask: (B, N, N) f32. Returns (out, h)."""
    B, N, din = x.shape
    H = params["wv"].shape[1]

    Bt = _choose_batch_tile(B, N, din, H)
    grid = (B // Bt,)

    grid_spec = pltpu.PrefetchScalarGridSpec(
        num_scalar_prefetch=0,
        grid=grid,
        in_specs=[
            pl.BlockSpec((Bt, N, din), lambda b: (b, 0, 0)),   # x
            pl.BlockSpec((Bt, N, N), lambda b: (b, 0, 0)),     # mask
            pl.BlockSpec((din, H), lambda b: (0, 0)),          # wv
            pl.BlockSpec((1, H), lambda b: (0, 0)),            # bv
        ],
        out_specs=[
            pl.BlockSpec((Bt, N, H), lambda b: (b, 0, 0)),     # out
            pl.BlockSpec((Bt, N, N), lambda b: (b, 0, 0)),     # h
        ],
    )

    cost = pl.CostEstimate(
        flops=2 * B * N * (din * H + N * H),
        transcendentals=B * N * N,
        bytes_accessed=4 * (B * N * din + 2 * B * N * N + B * N * H + din * H + H),
    )

    out, h = pl.pallas_call(
        _att_kernel,
        out_shape=(
            jax.ShapeDtypeStruct((B, N, H), jnp.float32),
            jax.ShapeDtypeStruct((B, N, N), jnp.float32),
        ),
        grid_spec=grid_spec,
        cost_estimate=cost,
        compiler_params=pltpu.CompilerParams(
            dimension_semantics=("parallel",),
            vmem_limit_bytes=48 * 1024 * 1024,
        ),
    )(x, mask, params["wv"], params["bv"])
    return out, h


def init_params(key, din, hidden_dim):
    ks = jax.random.split(key, 6)
    scale = 1.0 / jnp.sqrt(din)
    # Weights pre-transposed to (din, hidden) so the kernel computes x @ W.
    # wq/bq/wk/bk mirror the module's fcq/fck parameters but never influence
    # the outputs (their contribution is discarded by mask.view_as), so they
    # are not passed to the kernel.
    return {
        "wv": jax.random.uniform(ks[0], (din, hidden_dim), jnp.float32, -scale, scale),
        "bv": jax.random.uniform(ks[1], (1, hidden_dim), jnp.float32, -scale, scale),
        "wq": jax.random.uniform(ks[2], (din, hidden_dim), jnp.float32, -scale, scale),
        "bq": jax.random.uniform(ks[3], (1, hidden_dim), jnp.float32, -scale, scale),
        "wk": jax.random.uniform(ks[4], (din, hidden_dim), jnp.float32, -scale, scale),
        "bk": jax.random.uniform(ks[5], (1, hidden_dim), jnp.float32, -scale, scale),
    }


def reference_forward(x, mask, p):
    """Pure-JAX reference of the exact PyTorch semantics, for verification."""
    v = jax.nn.relu(x @ p["wv"] + p["bv"])
    h = mask
    h = jnp.where(h != 0, h, jnp.full_like(h, -900000.0))
    att = jax.nn.softmax(h, axis=2)
    out = jnp.einsum("bij,bjh->bih", att, v)
    return out, h


if __name__ == "__main__":
    B, N, din, hidden_dim = 2, 8, 16, 32

    key = jax.random.PRNGKey(0)
    kx, km, kp = jax.random.split(key, 3)

    x = jax.random.normal(kx, (B, N, din), dtype=jnp.float32)
    # binary adjacency-style mask with self-connections
    mask = (jax.random.uniform(km, (B, N, N)) > 0.5).astype(jnp.float32)
    eye = jnp.eye(N, dtype=jnp.float32)[None]
    mask = jnp.maximum(mask, jnp.broadcast_to(eye, (B, N, N)))

    params = init_params(kp, din, hidden_dim)

    out, h = att_model_forward(x, mask, params)
    out, h = jax.block_until_ready(out), jax.block_until_ready(h)

    out_ref, h_ref = reference_forward(x, mask, params)
    # 1e-4 tolerance on `out` covers the EUP approx-reciprocal (+1 Newton step)
    # in the softmax normalization; `h` is exact.
    assert jnp.allclose(out, out_ref, atol=1e-4, rtol=1e-4)
    assert jnp.allclose(h, h_ref, atol=1e-6, rtol=1e-6)

    print("KERNEL_OK")
</pallas_src>

<mosaic_0001>
module attributes {stable_mosaic.version = 11 : i64} {
  func.func @_att_kernel(%arg0: i32, %arg1: memref<2x8x16xf32, #tpu.memory_space<vmem>>, %arg2: memref<2x8x8xf32, #tpu.memory_space<vmem>>, %arg3: memref<16x32xf32, #tpu.memory_space<vmem>>, %arg4: memref<1x32xf32, #tpu.memory_space<vmem>>, %arg5: memref<2x8x32xf32, #tpu.memory_space<vmem>>, %arg6: memref<2x8x8xf32, #tpu.memory_space<vmem>>) attributes {dimension_semantics = [#tpu.dimension_semantics<parallel>], iteration_bounds = array<i64: 1>, scalar_prefetch = 0 : i64, scratch_operands = 0 : i64, tpu.core_type = #tpu.core_type<tc>, window_params = [{transform_indices = @transform_0, window_bounds = array<i64: 2, 8, 16>}, {transform_indices = @transform_1, window_bounds = array<i64: 2, 8, 8>}, {pipeline_mode = #tpu.pipeline_mode<synchronous>, transform_indices = @transform_2, window_bounds = array<i64: 16, 32>}, {pipeline_mode = #tpu.pipeline_mode<synchronous>, transform_indices = @transform_3, window_bounds = array<i64: 1, 32>}, {transform_indices = @transform_4, window_bounds = array<i64: 2, 8, 32>}, {transform_indices = @transform_5, window_bounds = array<i64: 2, 8, 8>}]} {
    %c0 = arith.constant 0 : index
    %c0_0 = arith.constant 0 : index
    %c0_1 = arith.constant 0 : index
    %0 = vector.load %arg1[%c0, %c0_0, %c0_1] : memref<2x8x16xf32, #tpu.memory_space<vmem>>, vector<2x8x16xf32>
    %1 = vector.shape_cast %0 : vector<2x8x16xf32> to vector<16x16xf32>
    %c0_2 = arith.constant 0 : index
    %c0_3 = arith.constant 0 : index
    %2 = vector.load %arg3[%c0_2, %c0_3] : memref<16x32xf32, #tpu.memory_space<vmem>>, vector<16x32xf32>
    %cst = arith.constant dense<0.000000e+00> : vector<16x32xf32>
    %3 = tpu.matmul %1, %2, %cst {dimension_numbers = #tpu.dot_dimension_numbers<[1], [0], [0], [1], [0, 0, 1, 1], [], []>} : vector<16x16xf32>, vector<16x32xf32>, vector<16x32xf32> -> vector<16x32xf32>
    %c0_4 = arith.constant 0 : index
    %c0_5 = arith.constant 0 : index
    %4 = vector.load %arg4[%c0_4, %c0_5] : memref<1x32xf32, #tpu.memory_space<vmem>>, vector<1x32xf32>
    %5 = vector.broadcast %4 : vector<1x32xf32> to vector<16x32xf32>
    %6 = arith.addf %3, %5 : vector<16x32xf32>
    %cst_6 = arith.constant 0.000000e+00 : f32
    %7 = vector.broadcast %cst_6 : f32 to vector<16x32xf32>
    %8 = arith.maximumf %6, %7 : vector<16x32xf32>
    %9 = vector.shape_cast %8 : vector<16x32xf32> to vector<2x8x32xf32>
    %c0_7 = arith.constant 0 : index
    %c0_8 = arith.constant 0 : index
    %c0_9 = arith.constant 0 : index
    %10 = vector.load %arg2[%c0_7, %c0_8, %c0_9] : memref<2x8x8xf32, #tpu.memory_space<vmem>>, vector<2x8x8xf32>
    %cst_10 = arith.constant 0.000000e+00 : f32
    %11 = vector.broadcast %cst_10 : f32 to vector<2x8x8xf32>
    %12 = arith.cmpf one, %10, %11 : vector<2x8x8xf32>
    %cst_11 = arith.constant -9.000000e+05 : f32
    %13 = vector.broadcast %cst_11 : f32 to vector<2x8x8xf32>
    %14 = arith.select %12, %10, %13 : vector<2x8x8xi1>, vector<2x8x8xf32>
    %cst_12 = arith.constant dense<0xFF800000> : vector<2x8xf32>
    %15 = vector.multi_reduction <maximumf>, %14, %cst_12 [2] : vector<2x8x8xf32> to vector<2x8xf32>
    %16 = vector.shape_cast %15 : vector<2x8xf32> to vector<2x8x1xf32>
    %17 = vector.broadcast %16 : vector<2x8x1xf32> to vector<2x8x8xf32>
    %18 = arith.subf %14, %17 : vector<2x8x8xf32>
    %19 = math.exp %18 : vector<2x8x8xf32>
    %cst_13 = arith.constant dense<0.000000e+00> : vector<2x8xf32>
    %20 = vector.multi_reduction <add>, %19, %cst_13 [2] : vector<2x8x8xf32> to vector<2x8xf32>
    %21 = vector.shape_cast %20 : vector<2x8xf32> to vector<2x8x1xf32>
    %22 = tpu.reciprocal %21 {approx = true} : vector<2x8x1xf32> -> vector<2x8x1xf32>
    %23 = arith.mulf %21, %22 : vector<2x8x1xf32>
    %cst_14 = arith.constant 2.000000e+00 : f32
    %24 = vector.broadcast %cst_14 : f32 to vector<2x8x1xf32>
    %25 = arith.subf %24, %23 : vector<2x8x1xf32>
    %26 = arith.mulf %22, %25 : vector<2x8x1xf32>
    %27 = vector.broadcast %26 : vector<2x8x1xf32> to vector<2x8x8xf32>
    %28 = arith.mulf %19, %27 : vector<2x8x8xf32>
    "tpu.trace_start"() <{level = 10 : i32, message = "bij,bjh->bih"}> : () -> ()
    %cst_15 = arith.constant dense<0.000000e+00> : vector<2x8x32xf32>
    %29 = tpu.matmul %28, %9, %cst_15 {dimension_numbers = #tpu.dot_dimension_numbers<[2], [1], [1], [2], [0, 0, 0, 1, 1, 2], [0], [0]>} : vector<2x8x8xf32>, vector<2x8x32xf32>, vector<2x8x32xf32> -> vector<2x8x32xf32>
    "tpu.trace_stop"() : () -> ()
    %c0_16 = arith.constant 0 : index
    %c0_17 = arith.constant 0 : index
    %c0_18 = arith.constant 0 : index
    %30 = vector.load %arg5[%c0_16, %c0_17, %c0_18] : memref<2x8x32xf32, #tpu.memory_space<vmem>>, vector<2x8x32xf32>
    tpu.vector_store %arg5[%c0_16, %c0_17, %c0_18], %29 {strides = array<i32>} : memref<2x8x32xf32, #tpu.memory_space<vmem>>, vector<2x8x32xf32>,
    %c0_19 = arith.constant 0 : index
    %c0_20 = arith.constant 0 : index
    %c0_21 = arith.constant 0 : index
    %31 = vector.load %arg6[%c0_19, %c0_20, %c0_21] : memref<2x8x8xf32, #tpu.memory_space<vmem>>, vector<2x8x8xf32>
    tpu.vector_store %arg6[%c0_19, %c0_20, %c0_21], %14 {strides = array<i32>} : memref<2x8x8xf32, #tpu.memory_space<vmem>>, vector<2x8x8xf32>,
    return
  }
  func.func @transform_0(%arg0: i32) -> (i32, i32, i32) {
    %c0_i32 = arith.constant 0 : i32
    %c0_i32_0 = arith.constant 0 : i32
    %c0_i32_1 = arith.constant 0 : i32
    return %arg0, %c0_i32, %c0_i32_0 : i32, i32, i32
  }
  func.func @transform_1(%arg0: i32) -> (i32, i32, i32) {
    %c0_i32 = arith.constant 0 : i32
    %c0_i32_0 = arith.constant 0 : i32
    %c0_i32_1 = arith.constant 0 : i32
    return %arg0, %c0_i32, %c0_i32_0 : i32, i32, i32
  }
  func.func @transform_2(%arg0: i32) -> (i32, i32) {
    %c0_i32 = arith.constant 0 : i32
    %c0_i32_0 = arith.constant 0 : i32
    %c0_i32_1 = arith.constant 0 : i32
    return %c0_i32, %c0_i32_0 : i32, i32
  }
  func.func @transform_3(%arg0: i32) -> (i32, i32) {
    %c0_i32 = arith.constant 0 : i32
    %c0_i32_0 = arith.constant 0 : i32
    %c0_i32_1 = arith.constant 0 : i32
    return %c0_i32, %c0_i32_0 : i32, i32
  }
  func.func @transform_4(%arg0: i32) -> (i32, i32, i32) {
    %c0_i32 = arith.constant 0 : i32
    %c0_i32_0 = arith.constant 0 : i32
    %c0_i32_1 = arith.constant 0 : i32
    return %arg0, %c0_i32, %c0_i32_0 : i32, i32, i32
  }
  func.func @transform_5(%arg0: i32) -> (i32, i32, i32) {
    %c0_i32 = arith.constant 0 : i32
    %c0_i32_0 = arith.constant 0 : i32
    %c0_i32_1 = arith.constant 0 : i32
    return %arg0, %c0_i32, %c0_i32_0 : i32, i32, i32
  }
}

</mosaic_0001>

<bundles_post_ra>
// kernel: tpu_custom_call.1
= control target key start
LH: loop header
LB: loop body
LE: loop exit
PB: predicated region body
PF: predicated region fallthrough
CT: control target
= control target key end

     0   :  { %11 = vsyncpa [#allocation3], 0  ;;  %s460_s0 = inlined_call_operand.hbm [shape: f32[2,8,16], index: 0, kind: input, shape index: {}]   ;;  %s461_s1 = inlined_call_operand.hbm [shape: f32[2,8,8], index: 1, kind: input, shape index: {}]   ;;  %s462_s2 = inlined_call_operand.hbm [shape: f32[16,32], index: 2, kind: input, shape index: {}]   ;;  %s463_s3 = inlined_call_operand.vmem [shape: f32[1,32], index: 3, kind: input, shape index: {}]   ;;  %s464_s4 = inlined_call_operand.hbm [shape: f32[2,8,32], index: 4, kind: output, shape index: {0}]   ;;  %s465_s5 = inlined_call_operand.hbm [shape: f32[2,8,8], index: 5, kind: output, shape index: {1}]  }
   0x1   :  { %12 = vsyncpa [#allocation6], 0 }
   0x2   :  { %13 = vsyncpa [#allocation4], 0 }
   0x3   :  { %14 = vsyncpa [#allocation10], 0  ;;  %s32_s20 = sshll.u32 %s461_s1, 4  ;;  %s382_s21 = smov [#allocation5]   ;;  %s33_s20 = int_to_ptr.hbm [resolvable:$true] %s32_s20 }
   0x4   :  { %s34_s22 = sshll.u32 %s382_s21, 4  ;;  %s19_s25 = sshll.u32 %s460_s0, 4  ;;  %s35_s22 = int_to_ptr.vmem [resolvable:$true] %s34_s22  ;;  %s20_s25 = int_to_ptr.hbm [resolvable:$true] %s19_s25 }
   0x5   :  { %s383_s26 = smov 128   ;;  %s384_s27 = smov 8  }
   0x6   :  { %40 = dma.hbm_to_vmem [thread:$0]  %s33_s20, 256, %s35_s22, [#allocation6], %s383_s26, %s383_s26, %s384_s27  }
   0x7   :  { %s385_s28 = smov [#allocation2]   ;;  %s45_s1 = sshll.u32 %s462_s2, 4  ;;  %s46_s1 = int_to_ptr.hbm [resolvable:$true] %s45_s1 }
   0x8   :  { %s21_s29 = sshll.u32 %s385_s28, 4  ;;  %s386_s0 = smov [#allocation7]   ;;  %s22_s29 = int_to_ptr.vmem [resolvable:$true] %s21_s29 }
   0x9   :  { %27 = dma.hbm_to_vmem [thread:$0]  %s20_s25, 256, %s22_s29, [#allocation3], %s383_s26, %s383_s26, %s384_s27  }
   0xa   :  { %s47_s7 = sshll.u32 %s386_s0, 4  ;;  %s48_s7 = int_to_ptr.vmem [resolvable:$true] %s47_s7 }
   0xb   :  { %53 = dma.hbm_to_vmem [thread:$0]  %s46_s1, 256, %s48_s7, [#allocation6], %s383_s26, %s383_s26, %s384_s27  }
   0xc   :  { %374 = dma.done.wait [#allocation3], 256  }
   0xd   :  { %375 = vsyncadd [#allocation3], 4294967040 }
   0xe   :  { %376 = dma.done.wait [#allocation6], 512  }
   0xf   :  { %377 = vsyncadd [#allocation6], 4294966784  ;;  %v109_v0 = vld [vmem:[#allocation5 + $0x8] sm:$0xff]  ;;  %vm114_vm0 = vcmask 64512   ;;  %v108_v1 = vld [vmem:[#allocation5] sm:$0xff]  ;;  %vm76_vm3 = vcmask 130048  }
  0x10   :  { %vm111_vm1 = vcmp.ne.f32.partialorder %v109_v0, 0.0  ;;  %vm110_vm2 = vcmp.ne.f32.partialorder %v108_v1, 0.0  ;;  %v71_v6 = vld [vmem:[#allocation7 + $0x8] sm:$0xff]  ;;  %v70_v7 = vld [vmem:[#allocation7] sm:$0xff]  ;;  %s213_s12 = sshll.u32 %s465_s5, 4  ;;  %vm189_vm4 = vcmask 261120   ;;  %s214_s12 = int_to_ptr.hbm [resolvable:$true] %s213_s12 }
  0x11   :  { %v113_v2 = vsel %vm111_vm1, %v109_v0, -900000.0  ;;  %v112_v4 = vsel %vm110_vm2, %v108_v1, -900000.0  ;;  %236 = vmatpush.msra.mxu3 %v71_v6  ;;  %97 = vmatpush.msra.mxu0 %v71_v6  ;;  %v69_v8 = vld [vmem:[#allocation2 + $0x8] sm:$0xff]  ;;  %v68_v9 = vld [vmem:[#allocation2] sm:$0xff] }
  0x12   :  { %v118_v3 = vsel %vm114_vm0, %v113_v2, -inf  ;;  %193 = vst.msk [vmem:[#allocation9 + $0x8] sm:$0xff] %vm114_vm0, %v113_v2  ;;  %v115_v5 = vsel %vm114_vm0, %v112_v4, -inf  ;;  %v245_v20 = vld [vmem:[%s463_s3] ss:$0 sm:$0xff]  ;;  %s387_s3 = smov [#allocation9]  }
  0x13   :  { %119 = vmax.xlane.f32.xlu0 %v118_v3  ;;  %192 = vst.msk [vmem:[#allocation9] sm:$0xff] %vm114_vm0, %v112_v4  ;;  %237 = vmatpush.msra.mxu3 %v70_v7  ;;  %s211_s9 = sshll.u32 %s387_s3, 4  ;;  %s388_s13 = smov [#allocation8]   ;;  %s212_s9 = int_to_ptr.vmem [resolvable:$true] %s211_s9 }
  0x14   :  { %98 = vmatpush.msra.mxu0 %v70_v7  ;;  %233 = vmatmul.msk.f32.vlgmr.msra.gmra.mxu3 %vm76_vm3, %v69_v8  ;;  %219 = dma.vmem_to_hbm [thread:$0]  %s212_s9, 256, %s214_s12, [#allocation10], %s383_s26, %s383_s26, %s384_s27  }
  0x15   :  { %232 = vmatmul.msk.f32.vlgmr.msra.gmra.mxu0 %vm76_vm3, %v68_v9  ;;  %s198_s14 = sshll.u32 %s388_s13, 4  ;;  %s200_s17 = sshll.u32 %s464_s4, 4  ;;  %s199_s14 = int_to_ptr.vmem [resolvable:$true] %s198_s14  ;;  %s201_s17 = int_to_ptr.hbm [resolvable:$true] %s200_s17 }
  0x1b   :  { %116 = vmax.xlane.f32.xlu0 %v115_v5 }
  0x86   :  { %v120_v10 = vpop.xlane.xlu0 %119 }
  0x87   :  { %v122_v11 = vsub.f32 %v113_v2, %v120_v10 }
  0x89   :  { %v125_v12 = vmul.f32 1.442695, %v122_v11 }
  0x8b   :  { %246 = vpow2.f32 %v125_v12 }
  0x8e   :  { %v117_v13 = vpop.xlane.xlu0 %116 }
  0x8f   :  { %v121_v14 = vsub.f32 %v112_v4, %v117_v13 }
  0x91   :  { %v247_v15 = vpop.eup %246  ;;  %v123_v16 = vmul.f32 1.442695, %v121_v14 }
  0x92   :  { %v130_v17 = vsel %vm114_vm0, %v247_v15, 0.0  ;;  %v100_v24 = vpop.f32.mrf.mxu0 }
  0x93   :  { %248 = vpow2.f32 %v123_v16  ;;  %131 = vadd.xlane.f32.xlu1 %v130_v17  ;;  %v101_v25 = vadd.f32 %v245_v20, %v100_v24 }
  0x95   :  { %v106_v26 = vmax.f32 %v101_v25, 0.0 }
  0x97   :  { %v103_v21 = vpop.f32.mrf.mxu3  ;;  %161 = vmatpush.msra.mxu1 %v106_v26 }
  0x98   :  { %v104_v22 = vadd.f32 %v245_v20, %v103_v21 }
  0x99   :  { %v249_v18 = vpop.eup %248 }
  0x9a   :  { %v127_v19 = vsel %vm114_vm0, %v249_v18, 0.0  ;;  %v107_v23 = vmax.f32 %v104_v22, 0.0 }
  0x9b   :  { %128 = vadd.xlane.f32.xlu1 %v127_v19 }
  0x9c   :  { %184 = vmatpush.msra.mxu2 %v107_v23 }
 0x106   :  { %v132_v27 = vpop.xlane.xlu1 %131 }
 0x107   :  { %250 = vrcp.f32 %v132_v27 }
 0x10d   :  { %v251_v28 = vpop.eup %250 }
 0x10e   :  { %v136_v29 = vmul.f32 %v251_v28, %v132_v27  ;;  %v129_v30 = vpop.xlane.xlu1 %128 }
 0x10f   :  { %252 = vrcp.f32 %v129_v30 }
 0x110   :  { %v138_v31 = vsub.f32 2.0, %v136_v29 }
 0x112   :  { %v140_v32 = vmul.f32 %v251_v28, %v138_v31 }
 0x114   :  { %v142_v33 = vmul.f32 %v247_v15, %v140_v32 }
 0x115   :  { %v253_v34 = vpop.eup %252 }
 0x116   :  { %v135_v35 = vmul.f32 %v253_v34, %v129_v30  ;;  %235 = vmatmul.msk.f32.vlgmr.msra.gmra.mxu2 %vm114_vm0, %v142_v33 }
 0x118   :  { %v137_v36 = vsub.f32 2.0, %v135_v35 }
 0x11a   :  { %v139_v37 = vmul.f32 %v253_v34, %v137_v36 }
 0x11c   :  { %v141_v38 = vmul.f32 %v249_v18, %v139_v37 }
 0x11e   :  { %234 = vmatmul.msk.f32.vlgmr.msra.gmra.mxu1 %vm114_vm0, %v141_v38 }
 0x199   :  { %v186_v39 = vpop.f32.mrf.mxu2 }
 0x19a   :  { %191 = vst.msk [vmem:[#allocation8 + $0x8] sm:$0xff] %vm189_vm4, %v186_v39 }
 0x19b   :  { %v163_v40 = vpop.f32.mrf.mxu1 }
 0x19c   :  { %190 = vst.msk [vmem:[#allocation8] sm:$0xff] %vm189_vm4, %v163_v40 }
 0x19d   :  { %206 = dma.vmem_to_hbm [thread:$0]  %s199_s14, 256, %s201_s17, [#allocation4], %s383_s26, %s383_s26, %s384_s27  }
 0x19e   :  { %378 = dma.done.wait [#allocation4], 256  }
 0x19f   :  { %379 = vsyncadd [#allocation4], 4294967040 }
 0x1a0   :  { %380 = dma.done.wait [#allocation10], 256  }
 0x1a1   :  { %381 = vsyncadd [#allocation10], 4294967040 }
 0x1a2   :  { %228 = vsyncpa [#allocation3], 1 }
 0x1a3   :  { %229 = vsyncpa [#allocation6], 1 }
 0x1a4   :  { %230 = vsyncpa [#allocation4], 1 }
 0x1a5   :  { %231 = vsyncpa [#allocation10], 1 }

</bundles_post_ra>
